<compile_context>
chip_gen: v5e
topology: v5e:2x2
jax: 0.10.0
libtpu: 0.0.40
codegen_flags: <defaults>
</compile_context>

<pallas_src>
import functools

import jax
import jax.numpy as jnp
from jax.experimental import pallas as pl
from jax.experimental.pallas import tpu as pltpu


def d_net_gauss_kernel(x_ref, w1_ref, b1_ref, w2_ref, b2_ref, w3_ref, b3_ref,
                       o_ref):
    # TODO(synk): F.dropout(p=0.2, training=True) is stochastic; here we use
    # eval-mode (identity) semantics. A training-mode kernel would draw a mask
    # via pltpu.prng_seed + pltpu.stateful_bernoulli and scale by 1/(1-p).
    x = x_ref[...]  # (TB, z_dim) bf16

    # lin1 + relu  (MXU bf16, f32 accumulation; elementwise tail in f32)
    h1 = jnp.dot(x, w1_ref[...], preferred_element_type=jnp.float32)
    h1 = jnp.maximum(h1 + b1_ref[...], 0.0)

    # lin2 + relu
    h2 = jnp.dot(h1.astype(jnp.bfloat16), w2_ref[...],
                 preferred_element_type=jnp.float32)
    h2 = jnp.maximum(h2 + b2_ref[...], 0.0)

    # lin3 + sigmoid: N->1 via VPU multiply + XLU lane reduction (MXU would be
    # <1% utilized for a 1-wide output).
    w3 = w3_ref[...].astype(jnp.float32)                  # (1, N)
    logits = jnp.sum(h2 * w3, axis=-1, keepdims=True)     # (TB, 1)
    logits = logits + b3_ref[0, 0]                        # SMEM scalar bias
    o_ref[...] = jax.nn.sigmoid(logits).astype(o_ref.dtype)


def _round_up(x, m):
    return pl.cdiv(x, m) * m


def _vmem_budget_bytes(tb, z_dim, n):
    bf16, f32 = 2, 4
    weights = z_dim * n * bf16 + n * n * bf16 + n * bf16 + 2 * n * f32
    per_step = 2 * tb * z_dim * bf16 + 2 * tb * f32 + 2 * tb * n * f32
    est = weights + per_step
    # generous headroom, but stay well inside v7x's 64 MiB / v5e's scoped VMEM
    return int(min(max(2 * est, 8 * 1024 * 1024), 48 * 1024 * 1024))


@functools.partial(jax.jit, static_argnames=("tb",))
def d_net_gauss_forward(x, w1, b1, w2, b2, w3, b3, *, tb=512):
    B, z_dim = x.shape
    N = w1.shape[1]

    # Batch tile: multiple of 8 (sublane), no larger than the (padded) batch.
    tb = int(min(tb, _round_up(B, 8)))
    B_pad = int(_round_up(B, tb))
    if B_pad != B:
        x = jnp.pad(x, ((0, B_pad - B), (0, 0)))

    # bf16 MXU operands; biases stay f32.
    x_bf = x.astype(jnp.bfloat16)
    w1_bf = w1.astype(jnp.bfloat16)
    w2_bf = w2.astype(jnp.bfloat16)
    w3_bf = w3.astype(jnp.bfloat16)

    grid = (B_pad // tb,)
    out = pl.pallas_call(
        d_net_gauss_kernel,
        out_shape=jax.ShapeDtypeStruct((B_pad, 1), jnp.float32),
        grid=grid,
        in_specs=[
            pl.BlockSpec((tb, z_dim), lambda i: (i, 0)),     # x: tiled on batch
            pl.BlockSpec((z_dim, N), lambda i: (0, 0)),      # w1: resident
            pl.BlockSpec((1, N), lambda i: (0, 0)),          # b1: resident
            pl.BlockSpec((N, N), lambda i: (0, 0)),          # w2: resident
            pl.BlockSpec((1, N), lambda i: (0, 0)),          # b2: resident
            pl.BlockSpec((1, N), lambda i: (0, 0)),          # w3: resident
            pl.BlockSpec(memory_space=pltpu.MemorySpace.SMEM),  # b3: scalar
        ],
        out_specs=pl.BlockSpec((tb, 1), lambda i: (i, 0)),
        compiler_params=pltpu.CompilerParams(
            dimension_semantics=("parallel",),
            vmem_limit_bytes=_vmem_budget_bytes(tb, z_dim, N),
        ),
    )(x_bf, w1_bf, b1, w2_bf, b2, w3_bf, b3)

    return out[:B]


def init_params(key, z_dim, N, dtype=jnp.float32):
    """Deterministic PyTorch-style Linear init: U(-1/sqrt(fan_in), 1/sqrt(fan_in))."""
    def linear(k, fan_in, fan_out, w_shape):
        kw, kb = jax.random.split(k)
        bound = 1.0 / jnp.sqrt(jnp.asarray(fan_in, dtype))
        w = jax.random.uniform(kw, w_shape, dtype, -bound, bound)
        b = jax.random.uniform(kb, (1, fan_out), dtype, -bound, bound)
        return w, b

    k1, k2, k3 = jax.random.split(key, 3)
    w1, b1 = linear(k1, z_dim, N, (z_dim, N))   # [in, out]
    w2, b2 = linear(k2, N, N, (N, N))           # [in, out]
    w3, b3 = linear(k3, N, 1, (1, N))           # [out=1, in=N] (PyTorch layout)
    return w1, b1, w2, b2, w3, b3


def reference_forward(x, w1, b1, w2, b2, w3, b3):
    """Pure-JAX reference replicating the kernel's bf16-operand / f32-acc math."""
    xb = x.astype(jnp.bfloat16)
    h1 = jnp.dot(xb, w1.astype(jnp.bfloat16),
                 preferred_element_type=jnp.float32)
    h1 = jnp.maximum(h1 + b1, 0.0)
    h2 = jnp.dot(h1.astype(jnp.bfloat16), w2.astype(jnp.bfloat16),
                 preferred_element_type=jnp.float32)
    h2 = jnp.maximum(h2 + b2, 0.0)
    w3f = w3.astype(jnp.bfloat16).astype(jnp.float32)
    logits = jnp.sum(h2 * w3f, axis=-1, keepdims=True) + b3[0, 0]
    return jax.nn.sigmoid(logits)


if __name__ == "__main__":
    # Small demo sizes; B deliberately not a multiple of the tile to exercise
    # the padding path, and tb < B to exercise multi-step batch pipelining.
    B, Z_DIM, N, TB = 250, 8, 128, 128

    key = jax.random.PRNGKey(0)
    kx, kp = jax.random.split(key)
    x = jax.random.normal(kx, (B, Z_DIM), dtype=jnp.float32)
    params = init_params(kp, Z_DIM, N)

    out = d_net_gauss_forward(x, *params, tb=TB)
    out = jax.block_until_ready(out)

    ref = reference_forward(x, *params)
    assert out.shape == (B, 1), out.shape
    assert jnp.allclose(out, ref, atol=2e-3, rtol=2e-3), (
        float(jnp.max(jnp.abs(out - ref))))

    print("KERNEL_OK")
</pallas_src>

<mosaic_0001>
module attributes {stable_mosaic.version = 11 : i64} {
  func.func @d_net_gauss_kernel(%arg0: i32, %arg1: memref<128x8xbf16, #tpu.memory_space<vmem>>, %arg2: memref<8x128xbf16, #tpu.memory_space<vmem>>, %arg3: memref<1x128xf32, #tpu.memory_space<vmem>>, %arg4: memref<128x128xbf16, #tpu.memory_space<vmem>>, %arg5: memref<1x128xf32, #tpu.memory_space<vmem>>, %arg6: memref<1x128xbf16, #tpu.memory_space<vmem>>, %arg7: memref<1x1xf32, #tpu.memory_space<smem>>, %arg8: memref<128x1xf32, #tpu.memory_space<vmem>>) attributes {dimension_semantics = [#tpu.dimension_semantics<parallel>], iteration_bounds = array<i64: 2>, scalar_prefetch = 0 : i64, scratch_operands = 0 : i64, tpu.core_type = #tpu.core_type<tc>, window_params = [{transform_indices = @transform_0, window_bounds = array<i64: 128, 8>}, {pipeline_mode = #tpu.pipeline_mode<synchronous>, transform_indices = @transform_1, window_bounds = array<i64: 8, 128>}, {pipeline_mode = #tpu.pipeline_mode<synchronous>, transform_indices = @transform_2, window_bounds = array<i64: 1, 128>}, {pipeline_mode = #tpu.pipeline_mode<synchronous>, transform_indices = @transform_3, window_bounds = array<i64: 128, 128>}, {pipeline_mode = #tpu.pipeline_mode<synchronous>, transform_indices = @transform_4, window_bounds = array<i64: 1, 128>}, {pipeline_mode = #tpu.pipeline_mode<synchronous>, transform_indices = @transform_5, window_bounds = array<i64: 1, 128>}, {transform_indices = @transform_6, window_bounds = array<i64: 1, 1>}, {transform_indices = @transform_7, window_bounds = array<i64: 128, 1>}]} {
    %c0 = arith.constant 0 : index
    %c0_0 = arith.constant 0 : index
    %0 = vector.load %arg1[%c0, %c0_0] : memref<128x8xbf16, #tpu.memory_space<vmem>>, vector<128x8xbf16>
    %c0_1 = arith.constant 0 : index
    %c0_2 = arith.constant 0 : index
    %1 = vector.load %arg2[%c0_1, %c0_2] : memref<8x128xbf16, #tpu.memory_space<vmem>>, vector<8x128xbf16>
    %cst = arith.constant dense<0.000000e+00> : vector<128x128xf32>
    %2 = tpu.matmul %0, %1, %cst {dimension_numbers = #tpu.dot_dimension_numbers<[1], [0], [0], [1], [0, 0, 1, 1], [], []>} : vector<128x8xbf16>, vector<8x128xbf16>, vector<128x128xf32> -> vector<128x128xf32>
    %c0_3 = arith.constant 0 : index
    %c0_4 = arith.constant 0 : index
    %3 = vector.load %arg3[%c0_3, %c0_4] : memref<1x128xf32, #tpu.memory_space<vmem>>, vector<1x128xf32>
    %4 = vector.broadcast %3 : vector<1x128xf32> to vector<128x128xf32>
    %5 = arith.addf %2, %4 : vector<128x128xf32>
    %cst_5 = arith.constant 0.000000e+00 : f32
    %6 = vector.broadcast %cst_5 : f32 to vector<128x128xf32>
    %7 = arith.maximumf %5, %6 : vector<128x128xf32>
    %8 = arith.truncf %7 : vector<128x128xf32> to vector<128x128xbf16>
    %c0_6 = arith.constant 0 : index
    %c0_7 = arith.constant 0 : index
    %9 = vector.load %arg4[%c0_6, %c0_7] : memref<128x128xbf16, #tpu.memory_space<vmem>>, vector<128x128xbf16>
    %cst_8 = arith.constant dense<0.000000e+00> : vector<128x128xf32>
    %10 = tpu.matmul %8, %9, %cst_8 {dimension_numbers = #tpu.dot_dimension_numbers<[1], [0], [0], [1], [0, 0, 1, 1], [], []>} : vector<128x128xbf16>, vector<128x128xbf16>, vector<128x128xf32> -> vector<128x128xf32>
    %c0_9 = arith.constant 0 : index
    %c0_10 = arith.constant 0 : index
    %11 = vector.load %arg5[%c0_9, %c0_10] : memref<1x128xf32, #tpu.memory_space<vmem>>, vector<1x128xf32>
    %12 = vector.broadcast %11 : vector<1x128xf32> to vector<128x128xf32>
    %13 = arith.addf %10, %12 : vector<128x128xf32>
    %cst_11 = arith.constant 0.000000e+00 : f32
    %14 = vector.broadcast %cst_11 : f32 to vector<128x128xf32>
    %15 = arith.maximumf %13, %14 : vector<128x128xf32>
    %c0_12 = arith.constant 0 : index
    %c0_13 = arith.constant 0 : index
    %16 = vector.load %arg6[%c0_12, %c0_13] : memref<1x128xbf16, #tpu.memory_space<vmem>>, vector<1x128xbf16>
    %17 = arith.extf %16 : vector<1x128xbf16> to vector<1x128xf32>
    %18 = vector.broadcast %17 : vector<1x128xf32> to vector<128x128xf32>
    %19 = arith.mulf %15, %18 : vector<128x128xf32>
    %cst_14 = arith.constant dense<0.000000e+00> : vector<128xf32>
    %20 = vector.multi_reduction <add>, %19, %cst_14 [1] : vector<128x128xf32> to vector<128xf32>
    %21 = vector.shape_cast %20 : vector<128xf32> to vector<128x1xf32>
    %c0_15 = arith.constant 0 : index
    %c0_16 = arith.constant 0 : index
    %22 = memref.load %arg7[%c0_15, %c0_16] : memref<1x1xf32, #tpu.memory_space<smem>>
    %23 = vector.broadcast %22 : f32 to vector<128x1xf32>
    %24 = arith.addf %21, %23 : vector<128x1xf32>
    %25 = arith.negf %24 : vector<128x1xf32>
    %26 = math.exp %25 : vector<128x1xf32>
    %cst_17 = arith.constant 1.000000e+00 : f32
    %27 = vector.broadcast %cst_17 : f32 to vector<128x1xf32>
    %28 = arith.addf %27, %26 : vector<128x1xf32>
    %29 = arith.divf %27, %28 : vector<128x1xf32>
    %c0_18 = arith.constant 0 : index
    %c0_19 = arith.constant 0 : index
    %30 = vector.load %arg8[%c0_18, %c0_19] : memref<128x1xf32, #tpu.memory_space<vmem>>, vector<128x1xf32>
    tpu.vector_store %arg8[%c0_18, %c0_19], %29 {strides = array<i32>} : memref<128x1xf32, #tpu.memory_space<vmem>>, vector<128x1xf32>,
    return
  }
  func.func @transform_0(%arg0: i32) -> (i32, i32) {
    %c0_i32 = arith.constant 0 : i32
    %c0_i32_0 = arith.constant 0 : i32
    return %arg0, %c0_i32 : i32, i32
  }
  func.func @transform_1(%arg0: i32) -> (i32, i32) {
    %c0_i32 = arith.constant 0 : i32
    %c0_i32_0 = arith.constant 0 : i32
    %c0_i32_1 = arith.constant 0 : i32
    return %c0_i32, %c0_i32_0 : i32, i32
  }
  func.func @transform_2(%arg0: i32) -> (i32, i32) {
    %c0_i32 = arith.constant 0 : i32
    %c0_i32_0 = arith.constant 0 : i32
    %c0_i32_1 = arith.constant 0 : i32
    return %c0_i32, %c0_i32_0 : i32, i32
  }
  func.func @transform_3(%arg0: i32) -> (i32, i32) {
    %c0_i32 = arith.constant 0 : i32
    %c0_i32_0 = arith.constant 0 : i32
    %c0_i32_1 = arith.constant 0 : i32
    return %c0_i32, %c0_i32_0 : i32, i32
  }
  func.func @transform_4(%arg0: i32) -> (i32, i32) {
    %c0_i32 = arith.constant 0 : i32
    %c0_i32_0 = arith.constant 0 : i32
    %c0_i32_1 = arith.constant 0 : i32
    return %c0_i32, %c0_i32_0 : i32, i32
  }
  func.func @transform_5(%arg0: i32) -> (i32, i32) {
    %c0_i32 = arith.constant 0 : i32
    %c0_i32_0 = arith.constant 0 : i32
    %c0_i32_1 = arith.constant 0 : i32
    return %c0_i32, %c0_i32_0 : i32, i32
  }
  func.func @transform_6(%arg0: i32) -> (i32, i32) {
    %c0_i32 = arith.constant 0 : i32
    %c0_i32_0 = arith.constant 0 : i32
    %c0_i32_1 = arith.constant 0 : i32
    return %c0_i32, %c0_i32_0 : i32, i32
  }
  func.func @transform_7(%arg0: i32) -> (i32, i32) {
    %c0_i32 = arith.constant 0 : i32
    %c0_i32_0 = arith.constant 0 : i32
    return %arg0, %c0_i32 : i32, i32
  }
}

</mosaic_0001>

<bundles_post_ra>
// kernel: d_net_gauss_forward.1
= control target key start
LH: loop header
LB: loop body
LE: loop exit
PB: predicated region body
PF: predicated region fallthrough
CT: control target
= control target key end

     0   :  { %s1275_s26 = smov 0   ;;  %s1428_s0 = inlined_call_operand.vmem [shape: bf16[256,8], index: 0, kind: input, shape index: {}]   ;;  %s1429_s1 = inlined_call_operand.vmem [shape: bf16[8,128], index: 1, kind: input, shape index: {}]   ;;  %s1430_s2 = inlined_call_operand.vmem [shape: f32[1,128], index: 2, kind: input, shape index: {}]   ;;  %s1431_s3 = inlined_call_operand.vmem [shape: bf16[128,128], index: 3, kind: input, shape index: {}]   ;;  %s1432_s4 = inlined_call_operand.vmem [shape: f32[1,128], index: 4, kind: input, shape index: {}]   ;;  %s1433_s5 = inlined_call_operand.vmem [shape: bf16[1,128], index: 5, kind: input, shape index: {}]   ;;  %s1434_s6 = inlined_call_operand.<no memory space> [shape: f32[1,1], index: 6, kind: input, shape index: {}]   ;;  %s1435_s7 = inlined_call_operand.vmem [shape: f32[256,1], index: 7, kind: output, shape index: {}]  }
   0x1   :  { %12 = sst [smem:[#allocation2]] %s1434_s6 }
   0x2 LB: > { %s1026_s27 = sadd.s32 4294967295, %s1230_s26   ;;  %p1030_p0 = scmp.ge.s32.totalorder %s1230_s26, 1  ;;  %s1230_s26 = sphi %s1275_s26, %s18_s26  }
   0x3   : > { %p239_p1 = scmp.lt.s32.totalorder %s1230_s26, 3 }
   0x5   : > { %p240_p2 = pnand %p1030_p0, %p239_p1 }
   0x6   : > { %s1031_s6 = sshll.u32 (!%p240_p2), %s1026_s27, 4  ;;  %s631_s11 = sld [smem:[#allocation2]] (!%p240_p2) }
   0x7   : > { %243 = sbr.rel (%p240_p2) target bundleno = 562 (0x232), region = 48  ;;  %p272_p3 = scmp.lt.s32.totalorder (!%p240_p2), %s1031_s6, 31 }
   0xc   : > { %v300_v0 = vld [vmem:[%s1429_s1] sm:$0xf]  ;;  %vm370_vm0 = vcmask 1043456   ;;  %s1437_s6 = smov (!%p272_p3, %s1031_s6), 31  ;;  %vm345_vm1 = vcmask 64512   ;;  %v1140_v6 = vld [vmem:[%s1431_s3 + $0x38] sm:$0xff] }
   0xd   : > { %v372_v1 = vsel %vm370_vm0, %v300_v0, 0  ;;  %s1032_s30 = sshll.u32 %s1437_s6, 2  ;;  %515 = vmatpush.bf16.msra.mxu1 %v1140_v6  ;;  %v1139_v7 = vld [vmem:[%s1431_s3 + $0x30] sm:$0xff]  ;;  %1142 = vmatpush.bf16.msra.mxu2 %v1140_v6  ;;  %v1138_v8 = vld [vmem:[%s1431_s3 + $0x28] sm:$0xff]  ;;  %v1137_v10 = vld [vmem:[%s1431_s3 + $0x20] sm:$0xff]  ;;  %s1034_s12 = sshll.u32 %s1437_s6, 3 }
   0xe   : > { %381 = vmatpush.bf16.msra.mxu0 %v372_v1  ;;  %1141 = vmatpush.bf16.msra.mxu3 %v372_v1  ;;  %s275_s10 = scalar_lea.vmem %s1428_s0, %s1032_s30  ;;  %v1136_v14 = vld [vmem:[%s1431_s3 + $0x18] sm:$0xff]  ;;  %v1135_v15 = vld [vmem:[%s1431_s3 + $0x10] sm:$0xff]  ;;  %v1134_v16 = vld [vmem:[%s1431_s3 + $0x8] sm:$0xff]  ;;  %s1379_s15 = scalar_lea.vmem %s1435_s7, %s1034_s12  ;;  %vm953_vm4 = vcmask 7168  }
   0xf   : > { %v1125_v2 = vld [vmem:[%s275_s10] sm:$0xff]  ;;  %v1126_v3 = vld [vmem:[%s275_s10 + $0x8] sm:$0xff]  ;;  %v1127_v4 = vld [vmem:[%s275_s10 + $0x10] sm:$0xff] }
  0x10   : > { %v1130_v5 = vld [vmem:[%s275_s10 + $0x28] sm:$0xff]  ;;  %v1128_v9 = vld [vmem:[%s275_s10 + $0x18] sm:$0xff]  ;;  %v1131_v11 = vld [vmem:[%s275_s10 + $0x30] sm:$0xff] }
  0x11   : > { %1067 = vmatmul.msk.bf16.vlgmr.msra.gmra.mxu0 %vm345_vm1, %v1125_v2  ;;  %1072 = vmatmul.msk.bf16.vlgmr.msra.gmra.mxu3 %vm345_vm1, %v1130_v5  ;;  %v1129_v12 = vld [vmem:[%s275_s10 + $0x20] sm:$0xff]  ;;  %v1132_v13 = vld [vmem:[%s275_s10 + $0x38] sm:$0xff] }
  0x12   : > { %516 = vmatpush.bf16.msra.mxu1 %v1139_v7  ;;  %1143 = vmatpush.bf16.msra.mxu2 %v1139_v7  ;;  %v1133_v17 = vld [vmem:[%s1431_s3] sm:$0xff] }
  0x13   : > { %v1158_v19 = vld [vmem:[%s1430_s2] ss:$0 sm:$0xff] }
  0x16   : > { %517 = vmatpush.bf16.msra.mxu1 %v1138_v8  ;;  %1144 = vmatpush.bf16.msra.mxu2 %v1138_v8 }
  0x1a   : > { %518 = vmatpush.bf16.msra.mxu1 %v1137_v10  ;;  %1145 = vmatpush.bf16.msra.mxu2 %v1137_v10 }
  0x1e   : > { %519 = vmatpush.bf16.msra.mxu1 %v1136_v14  ;;  %1146 = vmatpush.bf16.msra.mxu2 %v1136_v14 }
  0x21   : > { %1068 = vmatmul.msk.bf16.gmra.mxu0 %vm345_vm1, %v1126_v3  ;;  %1073 = vmatmul.msk.bf16.gmra.mxu3 %vm345_vm1, %v1131_v11  ;;  %v580_v11 = vld [vmem:[%s1433_s5] sm:$0x1] }
  0x22   : > { %520 = vmatpush.bf16.msra.mxu1 %v1135_v15  ;;  %1147 = vmatpush.bf16.msra.mxu2 %v1135_v15 }
  0x26   : > { %521 = vmatpush.bf16.msra.mxu1 %v1134_v16  ;;  %1148 = vmatpush.bf16.msra.mxu2 %v1134_v16 }
  0x2a   : > { %522 = vmatpush.bf16.msra.mxu1 %v1133_v17  ;;  %1149 = vmatpush.bf16.msra.mxu2 %v1133_v17 }
  0x31   : > { %1069 = vmatmul.msk.bf16.gmra.mxu0 %vm345_vm1, %v1127_v4  ;;  %1074 = vmatmul.msk.bf16.gmra.mxu3 %vm345_vm1, %v1132_v13  ;;  %v581_v13 = vunpack.c.l.bf16 %v580_v11 }
  0x33   : > { %v1336_v16 = vperm.slane %v581_v13, 0 }
  0x41   : > { %1070 = vmatmul.msk.bf16.gmra.mxu0 %vm345_vm1, %v1128_v9 }
  0x51   : > { %1071 = vmatmul.msk.bf16.gmra.mxu0 %vm345_vm1, %v1129_v12  ;;  %v1333_v12 = vld [vmem:[%s1432_s4] ss:$0 sm:$0xff] }
  0x8e   : > { %v383_v18 = vpop.f32.mrf.mxu0 }
  0x8f   : > { %v384_v20 = vadd.f32 %v1158_v19, %v383_v18 }
  0x91   : > { %v423_v23 = vmax.f32 %v384_v20, 0.0 }
  0x94   : > { %v408_v48 = vpop.f32.mrf.mxu3 }
  0x95   : > { %v409_v57 = vadd.f32 %v1158_v19, %v408_v48 }
  0x96   : > { %v385_v21 = vpop.f32.mrf.mxu0 }
  0x97   : > { %v386_v22 = vadd.f32 %v1158_v19, %v385_v21  ;;  %v433_v59 = vmax.f32 %v409_v57, 0.0 }
  0x99   : > { %v424_v24 = vmax.f32 %v386_v22, 0.0 }
  0x9b   : > { %v439_v25 = vpack.c.bf16 %v424_v24, %v423_v23 }
  0x9c   : > { %v410_v52 = vpop.f32.mrf.mxu3 }
  0x9d   : > { %523 = vmatmul.bf16.vlgmr.msra.gmra.mxu1 %v439_v25  ;;  %v411_v58 = vadd.f32 %v1158_v19, %v410_v52 }
  0x9e   : > { %v388_v26 = vpop.f32.mrf.mxu0 }
  0x9f   : > { %v389_v27 = vadd.f32 %v1158_v19, %v388_v26  ;;  %v434_v60 = vmax.f32 %v411_v58, 0.0 }
  0xa1   : > { %v425_v30 = vmax.f32 %v389_v27, 0.0  ;;  %v444_v61 = vpack.c.bf16 %v434_v60, %v433_v59 }
  0xa4   : > { %v413_v56 = vpop.f32.mrf.mxu3 }
  0xa5   : > { %v414_v63 = vadd.f32 %v1158_v19, %v413_v56 }
  0xa6   : > { %v390_v28 = vpop.f32.mrf.mxu0 }
  0xa7   : > { %v391_v29 = vadd.f32 %v1158_v19, %v390_v28  ;;  %v435_v2 = vmax.f32 %v414_v63, 0.0 }
  0xa9   : > { %v426_v31 = vmax.f32 %v391_v29, 0.0 }
  0xab   : > { %v440_v32 = vpack.c.bf16 %v426_v31, %v425_v30 }
  0xac   : > { %v415_v62 = vpop.f32.mrf.mxu3 }
  0xad   : > { %528 = vmatmul.bf16.gmra.mxu1 %v440_v32  ;;  %v416_v0 = vadd.f32 %v1158_v19, %v415_v62 }
  0xae   : > { %v393_v33 = vpop.f32.mrf.mxu0 }
  0xaf   : > { %v394_v34 = vadd.f32 %v1158_v19, %v393_v33  ;;  %v436_v3 = vmax.f32 %v416_v0, 0.0 }
  0xb1   : > { %v427_v37 = vmax.f32 %v394_v34, 0.0  ;;  %v445_v4 = vpack.c.bf16 %v436_v3, %v435_v2 }
  0xb4   : > { %v418_v1 = vpop.f32.mrf.mxu3 }
  0xb5   : > { %v419_v6 = vadd.f32 %v1158_v19, %v418_v1 }
  0xb6   : > { %v395_v35 = vpop.f32.mrf.mxu0 }
  0xb7   : > { %v396_v36 = vadd.f32 %v1158_v19, %v395_v35  ;;  %v437_v8 = vmax.f32 %v419_v6, 0.0 }
  0xb9   : > { %v428_v38 = vmax.f32 %v396_v36, 0.0 }
  0xbb   : > { %v441_v39 = vpack.c.bf16 %v428_v38, %v427_v37 }
  0xbc   : > { %v420_v5 = vpop.f32.mrf.mxu3 }
  0xbd   : > { %533 = vmatmul.bf16.gmra.mxu1 %v441_v39  ;;  %v421_v7 = vadd.f32 %v1158_v19, %v420_v5 }
  0xbe   : > { %v398_v40 = vpop.f32.mrf.mxu0 }
  0xbf   : > { %v399_v41 = vadd.f32 %v1158_v19, %v398_v40  ;;  %v438_v9 = vmax.f32 %v421_v7, 0.0 }
  0xc1   : > { %v429_v44 = vmax.f32 %v399_v41, 0.0  ;;  %v446_v10 = vpack.c.bf16 %v438_v9, %v437_v8  ;;  %v1366_v9 = vstv %s631_s11 }
  0xc6   : > { %v400_v42 = vpop.f32.mrf.mxu0 }
  0xc7   : > { %v401_v43 = vadd.f32 %v1158_v19, %v400_v42 }
  0xc9   : > { %v430_v45 = vmax.f32 %v401_v43, 0.0 }
  0xcb   : > { %v442_v46 = vpack.c.bf16 %v430_v45, %v429_v44 }
  0xcd   : > { %538 = vmatmul.bf16.gmra.mxu1 %v442_v46 }
  0xce   : > { %v403_v47 = vpop.f32.mrf.mxu0 }
  0xcf   : > { %v404_v49 = vadd.f32 %v1158_v19, %v403_v47 }
  0xd1   : > { %v431_v53 = vmax.f32 %v404_v49, 0.0 }
  0xd6   : > { %v405_v50 = vpop.f32.mrf.mxu0 }
  0xd7   : > { %v406_v51 = vadd.f32 %v1158_v19, %v405_v50 }
  0xd9   : > { %v432_v54 = vmax.f32 %v406_v51, 0.0 }
  0xdb   : > { %v443_v55 = vpack.c.bf16 %v432_v54, %v431_v53 }
  0xdd   : > { %543 = vmatmul.bf16.vlgmr.msra.gmra.mxu2 %v443_v55 }
  0xed   : > { %548 = vmatmul.bf16.gmra.mxu2 %v444_v61 }
  0xfd   : > { %553 = vmatmul.bf16.gmra.mxu2 %v445_v4 }
 0x10d   : > { %558 = vmatmul.bf16.gmra.mxu2 %v446_v10 }
 0x11a   : > { %v524_v14 = vpop.f32.mrf.mxu1 }
 0x11b   : > { %v525_v15 = vadd.f32 %v1333_v12, %v524_v14 }
 0x11d   : > { %v564_v17 = vmax.f32 %v525_v15, 0.0 }
 0x11f   : > { %v583_v18 = vmul.f32 %v1336_v16, %v564_v17 }
 0x121   : > { %599 = vadd.xlane.f32.xlu0 %v583_v18 }
 0x122   : > { %v526_v19 = vpop.f32.mrf.mxu1 }
 0x123   : > { %v527_v20 = vadd.f32 %v1333_v12, %v526_v19 }
 0x125   : > { %v565_v21 = vmax.f32 %v527_v20, 0.0 }
 0x127   : > { %v584_v22 = vmul.f32 %v1336_v16, %v565_v21 }
 0x129   : > { %601 = vadd.xlane.f32.xlu0 %v584_v22 }
 0x12a   : > { %v529_v23 = vpop.f32.mrf.mxu1 }
 0x12b   : > { %v530_v24 = vadd.f32 %v1333_v12, %v529_v23 }
 0x12d   : > { %v566_v25 = vmax.f32 %v530_v24, 0.0 }
 0x12f   : > { %v585_v26 = vmul.f32 %v1336_v16, %v566_v25 }
 0x131   : > { %603 = vadd.xlane.f32.xlu1 %v585_v26 }
 0x132   : > { %v531_v27 = vpop.f32.mrf.mxu1 }
 0x133   : > { %v532_v28 = vadd.f32 %v1333_v12, %v531_v27 }
 0x135   : > { %v567_v29 = vmax.f32 %v532_v28, 0.0 }
 0x137   : > { %v586_v30 = vmul.f32 %v1336_v16, %v567_v29 }
 0x139   : > { %605 = vadd.xlane.f32.xlu1 %v586_v30 }
 0x13a   : > { %v534_v31 = vpop.f32.mrf.mxu1 }
 0x13b   : > { %v535_v32 = vadd.f32 %v1333_v12, %v534_v31 }
 0x13d   : > { %v568_v33 = vmax.f32 %v535_v32, 0.0 }
 0x13f   : > { %v587_v34 = vmul.f32 %v1336_v16, %v568_v33 }
 0x141   : > { %607 = vadd.xlane.f32.xlu2 %v587_v34 }
 0x142   : > { %v536_v35 = vpop.f32.mrf.mxu1 }
 0x143   : > { %v537_v36 = vadd.f32 %v1333_v12, %v536_v35 }
 0x145   : > { %v569_v37 = vmax.f32 %v537_v36, 0.0 }
 0x147   : > { %v588_v38 = vmul.f32 %v1336_v16, %v569_v37 }
 0x149   : > { %609 = vadd.xlane.f32.xlu2 %v588_v38 }
 0x14a   : > { %v539_v39 = vpop.f32.mrf.mxu1 }
 0x14b   : > { %v540_v40 = vadd.f32 %v1333_v12, %v539_v39 }
 0x14d   : > { %v570_v41 = vmax.f32 %v540_v40, 0.0 }
 0x14f   : > { %v589_v42 = vmul.f32 %v1336_v16, %v570_v41 }
 0x151   : > { %611 = vadd.xlane.f32.xlu0 %v589_v42 }
 0x152   : > { %v541_v43 = vpop.f32.mrf.mxu1 }
 0x153   : > { %v542_v44 = vadd.f32 %v1333_v12, %v541_v43 }
 0x155   : > { %v571_v45 = vmax.f32 %v542_v44, 0.0 }
 0x157   : > { %v590_v46 = vmul.f32 %v1336_v16, %v571_v45 }
 0x159   : > { %613 = vadd.xlane.f32.xlu1 %v590_v46 }
 0x160   : > { %v544_v47 = vpop.f32.mrf.mxu2 }
 0x161   : > { %v545_v48 = vadd.f32 %v1333_v12, %v544_v47 }
 0x163   : > { %v572_v49 = vmax.f32 %v545_v48, 0.0 }
 0x165   : > { %v591_v50 = vmul.f32 %v1336_v16, %v572_v49 }
 0x167   : > { %615 = vadd.xlane.f32.xlu2 %v591_v50 }
 0x168   : > { %v546_v51 = vpop.f32.mrf.mxu2 }
 0x169   : > { %v547_v52 = vadd.f32 %v1333_v12, %v546_v51 }
 0x16b   : > { %v573_v53 = vmax.f32 %v547_v52, 0.0 }
 0x16d   : > { %v592_v54 = vmul.f32 %v1336_v16, %v573_v53 }
 0x16f   : > { %617 = vadd.xlane.f32.xlu0 %v592_v54 }
 0x170   : > { %v549_v55 = vpop.f32.mrf.mxu2 }
 0x171   : > { %v550_v56 = vadd.f32 %v1333_v12, %v549_v55 }
 0x173   : > { %v574_v57 = vmax.f32 %v550_v56, 0.0 }
 0x175   : > { %v593_v58 = vmul.f32 %v1336_v16, %v574_v57 }
 0x177   : > { %619 = vadd.xlane.f32.xlu1 %v593_v58 }
 0x178   : > { %v551_v59 = vpop.f32.mrf.mxu2 }
 0x179   : > { %v552_v60 = vadd.f32 %v1333_v12, %v551_v59 }
 0x17b   : > { %v575_v61 = vmax.f32 %v552_v60, 0.0 }
 0x17d   : > { %v594_v62 = vmul.f32 %v1336_v16, %v575_v61 }
 0x17f   : > { %621 = vadd.xlane.f32.xlu2 %v594_v62 }
 0x180   : > { %v554_v63 = vpop.f32.mrf.mxu2 }
 0x181   : > { %v555_v0 = vadd.f32 %v1333_v12, %v554_v63 }
 0x183   : > { %v576_v1 = vmax.f32 %v555_v0, 0.0 }
 0x185   : > { %v595_v2 = vmul.f32 %v1336_v16, %v576_v1 }
 0x187   : > { %623 = vadd.xlane.f32.xlu0 %v595_v2 }
 0x188   : > { %v556_v3 = vpop.f32.mrf.mxu2 }
 0x189   : > { %v557_v4 = vadd.f32 %v1333_v12, %v556_v3 }
 0x18b   : > { %v577_v5 = vmax.f32 %v557_v4, 0.0 }
 0x18d   : > { %v596_v6 = vmul.f32 %v1336_v16, %v577_v5 }
 0x18f   : > { %625 = vadd.xlane.f32.xlu1 %v596_v6 }
 0x190   : > { %v559_v7 = vpop.f32.mrf.mxu2 }
 0x191   : > { %v560_v8 = vadd.f32 %v1333_v12, %v559_v7 }
 0x193   : > { %v578_v10 = vmax.f32 %v560_v8, 0.0 }
 0x194   : > { %v600_v11 = vpop.xlane.xlu0 %599 }
 0x195   : > { %v633_v13 = vadd.f32 %v1366_v9, %v600_v11  ;;  %v597_v14 = vmul.f32 %v1336_v16, %v578_v10 }
 0x197   : > { %v1107_v15 = vmul.f32 -1.442695, %v633_v13  ;;  %627 = vadd.xlane.f32.xlu2 %v597_v14 }
 0x198   : > { %v561_v17 = vpop.f32.mrf.mxu2 }
 0x199   : > { %1160 = vpow2.f32 %v1107_v15  ;;  %v562_v18 = vadd.f32 %v1333_v12, %v561_v17 }
 0x19b   : > { %v579_v19 = vmax.f32 %v562_v18, 0.0 }
 0x19c   : > { %v602_v20 = vpop.xlane.xlu0 %601 }
 0x19d   : > { %v634_v21 = vadd.f32 %v1366_v9, %v602_v20  ;;  %v598_v22 = vmul.f32 %v1336_v16, %v579_v19 }
 0x19f   : > { %v1161_v23 = vpop.eup %1160  ;;  %v1108_v24 = vmul.f32 -1.442695, %v634_v21  ;;  %629 = vadd.xlane.f32.xlu0 %v598_v22 }
 0x1a0   : > { %v697_v25 = vadd.f32 1.0, %v1161_v23 }
 0x1a1   : > { %1162 = vpow2.f32 %v1108_v24 }
 0x1a2   : > { %1164 = vrcp.f32 %v697_v25  ;;  %v724_v33 = vand.u32 2147483648, %v697_v25  ;;  %v722_v35 = vand.u32 2147483647, %v697_v25  ;;  %vm718_vm3 = vweird.f32 %v697_v25 }
 0x1a4   : > { %v604_v26 = vpop.xlane.xlu1 %603  ;;  %v725_v41 = vor.u32 1.1754944e-38, %v724_v33  ;;  %vm723_vm6 = vcmp.eq.f32.partialorder %v722_v35, 8.507059e+37 }
 0x1a5   : > { %v635_v27 = vadd.f32 %v1366_v9, %v604_v26 }
 0x1a7   : > { %v1163_v28 = vpop.eup %1162  ;;  %v1109_v29 = vmul.f32 -1.442695, %v635_v27 }
 0x1a8   : > { %v1165_v30 = vpop.eup %1164  ;;  %v698_v12 = vadd.f32 1.0, %v1163_v28 }
 0x1a9   : > { %v714_v31 = vmul.f32 %v1165_v30, %v697_v25  ;;  %1166 = vpow2.f32 %v1109_v29  ;;  %vm719_vm2 = vweird.f32 %v1165_v30 }
 0x1aa   : > { %1168 = vrcp.f32 %v698_v12  ;;  %vm720_vm5 = vmor %vm718_vm3, %vm719_vm2  ;;  %v739_v47 = vand.u32 2147483648, %v698_v12  ;;  %v737_v50 = vand.u32 2147483647, %v698_v12  ;;  %vm733_vm8 = vweird.f32 %v698_v12 }
 0x1ab   : > { %v715_v32 = vsub.f32 1.0, %v714_v31 }
 0x1ac   : > { %v606_v16 = vpop.xlane.xlu1 %605  ;;  %v740_v56 = vor.u32 1.1754944e-38, %v739_v47  ;;  %vm738_vm10 = vcmp.eq.f32.partialorder %v737_v50, 8.507059e+37 }
 0x1ad   : > { %v716_v34 = vmul.f32 %v1165_v30, %v715_v32  ;;  %v636_v36 = vadd.f32 %v1366_v9, %v606_v16 }
 0x1af   : > { %v1167_v37 = vpop.eup %1166  ;;  %v717_v38 = vadd.f32 %v1165_v30, %v716_v34  ;;  %v1110_v39 = vmul.f32 -1.442695, %v636_v36 }
 0x1b0   : > { %v1169_v40 = vpop.eup %1168  ;;  %v699_v42 = vadd.f32 1.0, %v1167_v37 }
 0x1b1   : > { %v721_v43 = vsel %vm720_vm5, %v1165_v30, %v717_v38  ;;  %v729_v44 = vmul.f32 %v1169_v40, %v698_v12  ;;  %1170 = vpow2.f32 %v1110_v39  ;;  %vm734_vm7 = vweird.f32 %v1169_v40 }
 0x1b2   : > { %v726_v45 = vsel %vm723_vm6, %v725_v41, %v721_v43  ;;  %1172 = vrcp.f32 %v699_v42  ;;  %vm735_vm9 = vmor %vm733_vm8, %vm734_vm7  ;;  %v754_v62 = vand.u32 2147483648, %v699_v42  ;;  %v752_v1 = vand.u32 2147483647, %v699_v42 }
 0x1b3   : > { %954 = vst.msk [vmem:[%s1379_s15] sm:$0xff] %vm953_vm4, %v726_v45  ;;  %v730_v46 = vsub.f32 1.0, %v729_v44  ;;  %vm748_vm12 = vweird.f32 %v699_v42 }
 0x1b4   : > { %v608_v48 = vpop.xlane.xlu2 %607  ;;  %v755_v7 = vor.u32 1.1754944e-38, %v754_v62  ;;  %vm753_vm14 = vcmp.eq.f32.partialorder %v752_v1, 8.507059e+37 }
 0x1b5   : > { %v731_v49 = vmul.f32 %v1169_v40, %v730_v46  ;;  %v637_v51 = vadd.f32 %v1366_v9, %v608_v48 }
 0x1b7   : > { %v1171_v52 = vpop.eup %1170  ;;  %v732_v53 = vadd.f32 %v1169_v40, %v731_v49  ;;  %v1111_v54 = vmul.f32 -1.442695, %v637_v51 }
 0x1b8   : > { %v1173_v55 = vpop.eup %1172  ;;  %v700_v57 = vadd.f32 1.0, %v1171_v52 }
 0x1b9   : > { %v736_v58 = vsel %vm735_vm9, %v1169_v40, %v732_v53  ;;  %v744_v59 = vmul.f32 %v1173_v55, %v699_v42  ;;  %1174 = vpow2.f32 %v1111_v54  ;;  %vm749_vm11 = vweird.f32 %v1173_v55 }
 0x1ba   : > { %v741_v60 = vsel %vm738_vm10, %v740_v56, %v736_v58  ;;  %1176 = vrcp.f32 %v700_v57  ;;  %vm750_vm13 = vmor %vm748_vm12, %vm749_vm11  ;;  %v769_v15 = vand.u32 2147483648, %v700_v57  ;;  %v767_v19 = vand.u32 2147483647, %v700_v57 }
 0x1bb   : > { %955 = vst.msk [vmem:[%s1379_s15 + $0x8] sm:$0xff] %vm953_vm4, %v741_v60  ;;  %v745_v61 = vsub.f32 1.0, %v744_v59  ;;  %vm763_vm0 = vweird.f32 %v700_v57 }
 0x1bc   : > { %v610_v63 = vpop.xlane.xlu2 %609  ;;  %v770_v25 = vor.u32 1.1754944e-38, %v769_v15  ;;  %vm768_vm2 = vcmp.eq.f32.partialorder %v767_v19, 8.507059e+37 }
 0x1bd   : > { %v746_v0 = vmul.f32 %v1173_v55, %v745_v61  ;;  %v638_v2 = vadd.f32 %v1366_v9, %v610_v63 }
 0x1bf   : > { %v1175_v3 = vpop.eup %1174  ;;  %v747_v4 = vadd.f32 %v1173_v55, %v746_v0  ;;  %v1112_v5 = vmul.f32 -1.442695, %v638_v2 }
 0x1c0   : > { %v1177_v6 = vpop.eup %1176  ;;  %v701_v8 = vadd.f32 1.0, %v1175_v3 }
 0x1c1   : > { %v751_v10 = vsel %vm750_vm13, %v1173_v55, %v747_v4  ;;  %v759_v11 = vmul.f32 %v1177_v6, %v700_v57  ;;  %1178 = vpow2.f32 %v1112_v5  ;;  %vm764_vm15 = vweird.f32 %v1177_v6 }
 0x1c2   : > { %v756_v13 = vsel %vm753_vm14, %v755_v7, %v751_v10  ;;  %1180 = vrcp.f32 %v701_v8  ;;  %vm765_vm1 = vmor %vm763_vm0, %vm764_vm15  ;;  %v784_v12 = vand.u32 2147483648, %v701_v8  ;;  %v782_v33 = vand.u32 2147483647, %v701_v8 }
 0x1c3   : > { %956 = vst.msk [vmem:[%s1379_s15 + $0x10] sm:$0xff] %vm953_vm4, %v756_v13  ;;  %v760_v14 = vsub.f32 1.0, %v759_v11  ;;  %vm778_vm5 = vweird.f32 %v701_v8 }
 0x1c4   : > { %v612_v17 = vpop.xlane.xlu0 %611  ;;  %v785_v38 = vor.u32 1.1754944e-38, %v784_v12  ;;  %vm783_vm7 = vcmp.eq.f32.partialorder %v782_v33, 8.507059e+37 }
 0x1c5   : > { %v761_v18 = vmul.f32 %v1177_v6, %v760_v14  ;;  %v639_v20 = vadd.f32 %v1366_v9, %v612_v17 }
 0x1c7   : > { %v1179_v21 = vpop.eup %1178  ;;  %v762_v22 = vadd.f32 %v1177_v6, %v761_v18  ;;  %v1113_v23 = vmul.f32 -1.442695, %v639_v20 }
 0x1c8   : > { %v1181_v24 = vpop.eup %1180  ;;  %v702_v26 = vadd.f32 1.0, %v1179_v21 }
 0x1c9   : > { %v766_v27 = vsel %vm765_vm1, %v1177_v6, %v762_v22  ;;  %v774_v28 = vmul.f32 %v1181_v24, %v701_v8  ;;  %1182 = vpow2.f32 %v1113_v23  ;;  %vm779_vm3 = vweird.f32 %v1181_v24 }
 0x1ca   : > { %v771_v29 = vsel %vm768_vm2, %v770_v25, %v766_v27  ;;  %1184 = vrcp.f32 %v702_v26  ;;  %vm780_vm6 = vmor %vm778_vm5, %vm779_vm3  ;;  %v799_v44 = vand.u32 2147483648, %v702_v26  ;;  %v797_v46 = vand.u32 2147483647, %v702_v26 }
 0x1cb   : > { %957 = vst.msk [vmem:[%s1379_s15 + $0x18] sm:$0xff] %vm953_vm4, %v771_v29  ;;  %v775_v30 = vsub.f32 1.0, %v774_v28  ;;  %vm793_vm9 = vweird.f32 %v702_v26 }
 0x1cc   : > { %v614_v31 = vpop.xlane.xlu1 %613  ;;  %v800_v50 = vor.u32 1.1754944e-38, %v799_v44  ;;  %vm798_vm11 = vcmp.eq.f32.partialorder %v797_v46, 8.507059e+37 }
 0x1cd   : > { %v776_v32 = vmul.f32 %v1181_v24, %v775_v30  ;;  %v640_v16 = vadd.f32 %v1366_v9, %v614_v31 }
 0x1cf   : > { %v1183_v34 = vpop.eup %1182  ;;  %v777_v35 = vadd.f32 %v1181_v24, %v776_v32  ;;  %v1114_v36 = vmul.f32 -1.442695, %v640_v16 }
 0x1d0   : > { %v1185_v37 = vpop.eup %1184  ;;  %v703_v39 = vadd.f32 1.0, %v1183_v34 }
 0x1d1   : > { %v781_v40 = vsel %vm780_vm6, %v1181_v24, %v777_v35  ;;  %v789_v41 = vmul.f32 %v1185_v37, %v702_v26  ;;  %1186 = vpow2.f32 %v1114_v36  ;;  %vm794_vm8 = vweird.f32 %v1185_v37 }
 0x1d2   : > { %v786_v42 = vsel %vm783_vm7, %v785_v38, %v781_v40  ;;  %1188 = vrcp.f32 %v703_v39  ;;  %vm795_vm10 = vmor %vm793_vm9, %vm794_vm8  ;;  %v814_v58 = vand.u32 2147483648, %v703_v39  ;;  %v812_v60 = vand.u32 2147483647, %v703_v39 }
 0x1d3   : > { %958 = vst.msk [vmem:[%s1379_s15 + $0x20] sm:$0xff] %vm953_vm4, %v786_v42  ;;  %v790_v43 = vsub.f32 1.0, %v789_v41  ;;  %vm808_vm13 = vweird.f32 %v703_v39 }
 0x1d4   : > { %v815_v0 = vor.u32 1.1754944e-38, %v814_v58  ;;  %vm813_vm15 = vcmp.eq.f32.partialorder %v812_v60, 8.507059e+37 }
 0x1d5   : > { %v791_v45 = vmul.f32 %v1185_v37, %v790_v43 }
 0x1d7   : > { %v1187_v47 = vpop.eup %1186  ;;  %v792_v48 = vadd.f32 %v1185_v37, %v791_v45 }
 0x1d8   : > { %v1189_v49 = vpop.eup %1188  ;;  %v704_v51 = vadd.f32 1.0, %v1187_v47 }
 0x1d9   : > { %v796_v52 = vsel %vm795_vm10, %v1185_v37, %v792_v48  ;;  %v804_v53 = vmul.f32 %v1189_v49, %v703_v39  ;;  %vm809_vm12 = vweird.f32 %v1189_v49 }
 0x1da   : > { %v801_v54 = vsel %vm798_vm11, %v800_v50, %v796_v52  ;;  %1190 = vrcp.f32 %v704_v51  ;;  %v616_v55 = vpop.xlane.xlu2 %615  ;;  %vm810_vm14 = vmor %vm808_vm13, %vm809_vm12  ;;  %v829_v7 = vand.u32 2147483648, %v704_v51  ;;  %v827_v11 = vand.u32 2147483647, %v704_v51 }
 0x1db   : > { %959 = vst.msk [vmem:[%s1379_s15 + $0x28] sm:$0xff] %vm953_vm4, %v801_v54  ;;  %v805_v56 = vsub.f32 1.0, %v804_v53  ;;  %v641_v57 = vadd.f32 %v1366_v9, %v616_v55  ;;  %vm823_vm1 = vweird.f32 %v704_v51 }
 0x1dc   : > { %v830_v17 = vor.u32 1.1754944e-38, %v829_v7  ;;  %vm828_vm3 = vcmp.eq.f32.partialorder %v827_v11, 8.507059e+37 }
 0x1dd   : > { %v806_v59 = vmul.f32 %v1189_v49, %v805_v56  ;;  %v1115_v61 = vmul.f32 -1.442695, %v641_v57 }
 0x1df   : > { %v807_v62 = vadd.f32 %v1189_v49, %v806_v59  ;;  %1192 = vpow2.f32 %v1115_v61 }
 0x1e0   : > { %v1191_v63 = vpop.eup %1190 }
 0x1e1   : > { %v811_v1 = vsel %vm810_vm14, %v1189_v49, %v807_v62  ;;  %v819_v2 = vmul.f32 %v1191_v63, %v704_v51  ;;  %vm824_vm0 = vweird.f32 %v1191_v63 }
 0x1e2   : > { %v816_v3 = vsel %vm813_vm15, %v815_v0, %v811_v1  ;;  %v618_v4 = vpop.xlane.xlu0 %617  ;;  %vm825_vm2 = vmor %vm823_vm1, %vm824_vm0 }
 0x1e3   : > { %960 = vst.msk [vmem:[%s1379_s15 + $0x30] sm:$0xff] %vm953_vm4, %v816_v3  ;;  %v820_v5 = vsub.f32 1.0, %v819_v2  ;;  %v642_v6 = vadd.f32 %v1366_v9, %v618_v4 }
 0x1e5   : > { %v1193_v8 = vpop.eup %1192  ;;  %v821_v10 = vmul.f32 %v1191_v63, %v820_v5  ;;  %v1116_v13 = vmul.f32 -1.442695, %v642_v6 }
 0x1e6   : > { %v705_v14 = vadd.f32 1.0, %v1193_v8 }
 0x1e7   : > { %v822_v15 = vadd.f32 %v1191_v63, %v821_v10  ;;  %1194 = vpow2.f32 %v1116_v13 }
 0x1e8   : > { %1196 = vrcp.f32 %v705_v14  ;;  %v844_v28 = vand.u32 2147483648, %v705_v14  ;;  %v842_v12 = vand.u32 2147483647, %v705_v14  ;;  %vm838_vm6 = vweird.f32 %v705_v14 }
 0x1e9   : > { %v826_v18 = vsel %vm825_vm2, %v1191_v63, %v822_v15 }
 0x1ea   : > { %v831_v19 = vsel %vm828_vm3, %v830_v17, %v826_v18  ;;  %v620_v20 = vpop.xlane.xlu1 %619  ;;  %v845_v35 = vor.u32 1.1754944e-38, %v844_v28  ;;  %vm843_vm8 = vcmp.eq.f32.partialorder %v842_v12, 8.507059e+37 }
 0x1eb   : > { %961 = vst.msk [vmem:[%s1379_s15 + $0x38] sm:$0xff] %vm953_vm4, %v831_v19  ;;  %v643_v21 = vadd.f32 %v1366_v9, %v620_v20 }
 0x1ed   : > { %v1195_v22 = vpop.eup %1194  ;;  %v1117_v23 = vmul.f32 -1.442695, %v643_v21 }
 0x1ee   : > { %v1197_v24 = vpop.eup %1196  ;;  %v706_v25 = vadd.f32 1.0, %v1195_v22 }
 0x1ef   : > { %v834_v26 = vmul.f32 %v1197_v24, %v705_v14  ;;  %1198 = vpow2.f32 %v1117_v23  ;;  %vm839_vm5 = vweird.f32 %v1197_v24 }
 0x1f0   : > { %1200 = vrcp.f32 %v706_v25  ;;  %vm840_vm7 = vmor %vm838_vm6, %vm839_vm5  ;;  %v859_v41 = vand.u32 2147483648, %v706_v25  ;;  %v857_v44 = vand.u32 2147483647, %v706_v25  ;;  %vm853_vm10 = vweird.f32 %v706_v25 }
 0x1f1   : > { %v835_v27 = vsub.f32 1.0, %v834_v26 }
 0x1f2   : > { %v622_v29 = vpop.xlane.xlu2 %621  ;;  %v860_v50 = vor.u32 1.1754944e-38, %v859_v41  ;;  %vm858_vm12 = vcmp.eq.f32.partialorder %v857_v44, 8.507059e+37 }
 0x1f3   : > { %v836_v30 = vmul.f32 %v1197_v24, %v835_v27  ;;  %v644_v31 = vadd.f32 %v1366_v9, %v622_v29 }
 0x1f5   : > { %v1199_v32 = vpop.eup %1198  ;;  %v837_v33 = vadd.f32 %v1197_v24, %v836_v30  ;;  %v1118_v16 = vmul.f32 -1.442695, %v644_v31 }
 0x1f6   : > { %v1201_v34 = vpop.eup %1200  ;;  %v707_v36 = vadd.f32 1.0, %v1199_v32 }
 0x1f7   : > { %v841_v37 = vsel %vm840_vm7, %v1197_v24, %v837_v33  ;;  %v849_v38 = vmul.f32 %v1201_v34, %v706_v25  ;;  %1202 = vpow2.f32 %v1118_v16  ;;  %vm854_vm9 = vweird.f32 %v1201_v34 }
 0x1f8   : > { %v846_v39 = vsel %vm843_vm8, %v845_v35, %v841_v37  ;;  %1204 = vrcp.f32 %v707_v36  ;;  %vm855_vm11 = vmor %vm853_vm10, %vm854_vm9  ;;  %v874_v56 = vand.u32 2147483648, %v707_v36  ;;  %v872_v59 = vand.u32 2147483647, %v707_v36 }
 0x1f9   : > { %962 = vst.msk [vmem:[%s1379_s15 + $0x40] sm:$0xff] %vm953_vm4, %v846_v39  ;;  %v850_v40 = vsub.f32 1.0, %v849_v38  ;;  %vm868_vm14 = vweird.f32 %v707_v36 }
 0x1fa   : > { %v624_v42 = vpop.xlane.xlu0 %623  ;;  %v875_v1 = vor.u32 1.1754944e-38, %v874_v56  ;;  %vm873_vm0 = vcmp.eq.f32.partialorder %v872_v59, 8.507059e+37 }
 0x1fb   : > { %v851_v43 = vmul.f32 %v1201_v34, %v850_v40  ;;  %v645_v45 = vadd.f32 %v1366_v9, %v624_v42 }
 0x1fd   : > { %v1203_v46 = vpop.eup %1202  ;;  %v852_v47 = vadd.f32 %v1201_v34, %v851_v43  ;;  %v1119_v48 = vmul.f32 -1.442695, %v645_v45 }
 0x1fe   : > { %v1205_v49 = vpop.eup %1204  ;;  %v708_v51 = vadd.f32 1.0, %v1203_v46 }
 0x1ff   : > { %v856_v52 = vsel %vm855_vm11, %v1201_v34, %v852_v47  ;;  %v864_v53 = vmul.f32 %v1205_v49, %v707_v36  ;;  %1206 = vpow2.f32 %v1119_v48  ;;  %vm869_vm13 = vweird.f32 %v1205_v49 }
 0x200   : > { %v861_v54 = vsel %vm858_vm12, %v860_v50, %v856_v52  ;;  %1208 = vrcp.f32 %v708_v51  ;;  %vm870_vm15 = vmor %vm868_vm14, %vm869_vm13  ;;  %v889_v7 = vand.u32 2147483648, %v708_v51  ;;  %v887_v11 = vand.u32 2147483647, %v708_v51 }
 0x201   : > { %963 = vst.msk [vmem:[%s1379_s15 + $0x48] sm:$0xff] %vm953_vm4, %v861_v54  ;;  %v865_v55 = vsub.f32 1.0, %v864_v53  ;;  %vm883_vm2 = vweird.f32 %v708_v51 }
 0x202   : > { %v626_v57 = vpop.xlane.xlu1 %625  ;;  %v890_v19 = vor.u32 1.1754944e-38, %v889_v7  ;;  %vm888_vm5 = vcmp.eq.f32.partialorder %v887_v11, 8.507059e+37 }
 0x203   : > { %v866_v58 = vmul.f32 %v1205_v49, %v865_v55  ;;  %v646_v60 = vadd.f32 %v1366_v9, %v626_v57 }
 0x205   : > { %v1207_v61 = vpop.eup %1206  ;;  %v867_v62 = vadd.f32 %v1205_v49, %v866_v58  ;;  %v1120_v63 = vmul.f32 -1.442695, %v646_v60 }
 0x206   : > { %v1209_v0 = vpop.eup %1208  ;;  %v709_v2 = vadd.f32 1.0, %v1207_v61 }
 0x207   : > { %v871_v3 = vsel %vm870_vm15, %v1205_v49, %v867_v62  ;;  %v879_v4 = vmul.f32 %v1209_v0, %v708_v51  ;;  %1210 = vpow2.f32 %v1120_v63  ;;  %vm884_vm1 = vweird.f32 %v1209_v0 }
 0x208   : > { %v876_v5 = vsel %vm873_vm0, %v875_v1, %v871_v3  ;;  %1212 = vrcp.f32 %v709_v2  ;;  %vm885_vm3 = vmor %vm883_vm2, %vm884_vm1  ;;  %v904_v25 = vand.u32 2147483648, %v709_v2  ;;  %v902_v28 = vand.u32 2147483647, %v709_v2 }
 0x209   : > { %964 = vst.msk [vmem:[%s1379_s15 + $0x50] sm:$0xff] %vm953_vm4, %v876_v5  ;;  %v880_v6 = vsub.f32 1.0, %v879_v4  ;;  %vm898_vm7 = vweird.f32 %v709_v2 }
 0x20a   : > { %v628_v8 = vpop.xlane.xlu2 %627  ;;  %v905_v33 = vor.u32 1.1754944e-38, %v904_v25  ;;  %vm903_vm9 = vcmp.eq.f32.partialorder %v902_v28, 8.507059e+37 }
 0x20b   : > { %v881_v10 = vmul.f32 %v1209_v0, %v880_v6  ;;  %v647_v13 = vadd.f32 %v1366_v9, %v628_v8 }
 0x20d   : > { %v1211_v14 = vpop.eup %1210  ;;  %v882_v15 = vadd.f32 %v1209_v0, %v881_v10  ;;  %v1121_v17 = vmul.f32 -1.442695, %v647_v13 }
 0x20e   : > { %v1213_v18 = vpop.eup %1212  ;;  %v710_v20 = vadd.f32 1.0, %v1211_v14 }
 0x20f   : > { %v886_v21 = vsel %vm885_vm3, %v1209_v0, %v882_v15  ;;  %v894_v22 = vmul.f32 %v1213_v18, %v709_v2  ;;  %1214 = vpow2.f32 %v1121_v17  ;;  %vm899_vm6 = vweird.f32 %v1213_v18 }
 0x210   : > { %v891_v23 = vsel %vm888_vm5, %v890_v19, %v886_v21  ;;  %1216 = vrcp.f32 %v710_v20  ;;  %vm900_vm8 = vmor %vm898_vm7, %vm899_vm6  ;;  %v919_v38 = vand.u32 2147483648, %v710_v20  ;;  %v917_v39 = vand.u32 2147483647, %v710_v20 }
 0x211   : > { %965 = vst.msk [vmem:[%s1379_s15 + $0x58] sm:$0xff] %vm953_vm4, %v891_v23  ;;  %v895_v24 = vsub.f32 1.0, %v894_v22  ;;  %vm913_vm11 = vweird.f32 %v710_v20 }
 0x212   : > { %v630_v26 = vpop.xlane.xlu0 %629  ;;  %v920_v43 = vor.u32 1.1754944e-38, %v919_v38  ;;  %vm918_vm13 = vcmp.eq.f32.partialorder %v917_v39, 8.507059e+37 }
 0x213   : > { %v896_v27 = vmul.f32 %v1213_v18, %v895_v24  ;;  %v648_v29 = vadd.f32 %v1366_v9, %v630_v26 }
 0x215   : > { %v1215_v30 = vpop.eup %1214  ;;  %v897_v12 = vadd.f32 %v1213_v18, %v896_v27  ;;  %v1122_v31 = vmul.f32 -1.442695, %v648_v29 }
 0x216   : > { %v1217_v32 = vpop.eup %1216  ;;  %v711_v16 = vadd.f32 1.0, %v1215_v30 }
 0x217   : > { %v901_v34 = vsel %vm900_vm8, %v1213_v18, %v897_v12  ;;  %v909_v35 = vmul.f32 %v1217_v32, %v710_v20  ;;  %1218 = vpow2.f32 %v1122_v31  ;;  %vm914_vm10 = vweird.f32 %v1217_v32 }
 0x218   : > { %v906_v36 = vsel %vm903_vm9, %v905_v33, %v901_v34  ;;  %1220 = vrcp.f32 %v711_v16  ;;  %vm915_vm12 = vmor %vm913_vm11, %vm914_vm10  ;;  %v934_v49 = vand.u32 2147483648, %v711_v16  ;;  %v932_v51 = vand.u32 2147483647, %v711_v16 }
 0x219   : > { %966 = vst.msk [vmem:[%s1379_s15 + $0x60] sm:$0xff] %vm953_vm4, %v906_v36  ;;  %v910_v37 = vsub.f32 1.0, %v909_v35  ;;  %vm928_vm15 = vweird.f32 %v711_v16 }
 0x21a   : > { %v935_v54 = vor.u32 1.1754944e-38, %v934_v49  ;;  %vm933_vm1 = vcmp.eq.f32.partialorder %v932_v51, 8.507059e+37 }
 0x21b   : > { %v911_v9 = vmul.f32 %v1217_v32, %v910_v37 }
 0x21d   : > { %v1219_v40 = vpop.eup %1218  ;;  %v912_v41 = vadd.f32 %v1217_v32, %v911_v9 }
 0x21e   : > { %v1221_v42 = vpop.eup %1220  ;;  %v712_v44 = vadd.f32 1.0, %v1219_v40 }
 0x21f   : > { %v916_v45 = vsel %vm915_vm12, %v1217_v32, %v912_v41  ;;  %v924_v46 = vmul.f32 %v1221_v42, %v711_v16  ;;  %vm929_vm14 = vweird.f32 %v1221_v42 }
 0x220   : > { %v921_v47 = vsel %vm918_vm13, %v920_v43, %v916_v45  ;;  %1222 = vrcp.f32 %v712_v44  ;;  %vm930_vm0 = vmor %vm928_vm15, %vm929_vm14  ;;  %v949_v59 = vand.u32 2147483648, %v712_v44  ;;  %v947_v61 = vand.u32 2147483647, %v712_v44 }
 0x221   : > { %967 = vst.msk [vmem:[%s1379_s15 + $0x68] sm:$0xff] %vm953_vm4, %v921_v47  ;;  %v925_v48 = vsub.f32 1.0, %v924_v46  ;;  %vm943_vm3 = vweird.f32 %v712_v44 }
 0x222   : > { %v950_v63 = vor.u32 1.1754944e-38, %v949_v59  ;;  %vm948_vm6 = vcmp.eq.f32.partialorder %v947_v61, 8.507059e+37 }
 0x223   : > { %v926_v50 = vmul.f32 %v1221_v42, %v925_v48 }
 0x225   : > { %v927_v52 = vadd.f32 %v1221_v42, %v926_v50 }
 0x226   : > { %v1223_v53 = vpop.eup %1222 }
 0x227   : > { %v931_v55 = vsel %vm930_vm0, %v1221_v42, %v927_v52  ;;  %v939_v56 = vmul.f32 %v1223_v53, %v712_v44  ;;  %vm944_vm2 = vweird.f32 %v1223_v53 }
 0x228   : > { %v936_v57 = vsel %vm933_vm1, %v935_v54, %v931_v55  ;;  %vm945_vm5 = vmor %vm943_vm3, %vm944_vm2 }
 0x229   : > { %968 = vst.msk [vmem:[%s1379_s15 + $0x70] sm:$0xff] %vm953_vm4, %v936_v57  ;;  %v940_v58 = vsub.f32 1.0, %v939_v56 }
 0x22b   : > { %v941_v60 = vmul.f32 %v1223_v53, %v940_v58 }
 0x22d   : > { %v942_v62 = vadd.f32 %v1223_v53, %v941_v60 }
 0x22f   : > { %v946_v0 = vsel %vm945_vm5, %v1223_v53, %v942_v62 }
 0x230   : > { %v951_v1 = vsel %vm948_vm6, %v950_v63, %v946_v0 }
 0x231   : > { %969 = vst.msk [vmem:[%s1379_s15 + $0x78] sm:$0xff] %vm953_vm4, %v951_v1 }
 0x232 PF: > { %s18_s26 = sadd.s32 1, %s1230_s26  }
 0x233   : > { %p15_p4 = scmp.ge.s32.totalorder %s18_s26, 4  }
 0x235   :  { %17 = sbr.rel (!%p15_p4) target bundleno = 2 (0x2), region = 78 }

</bundles_post_ra>
